<compile_context>
chip_gen: v7x
topology: tpu7x:2x2x1
jax: 0.10.0
libtpu: 0.0.40
codegen_flags: <defaults>
</compile_context>

<pallas_src>
import jax
import jax.numpy as jnp
from jax.experimental import pallas as pl
from jax.experimental.pallas import tpu as pltpu


def _linear_kernel(x_ref, w_ref, b_ref, o_ref):
    """x_ref: (TB, in_f) VMEM; w_ref: (2, in_f) VMEM (PyTorch layout);
    b_ref: (2,) SMEM scalars; o_ref: (TB, 2) VMEM."""
    x = x_ref[...]                                   # (TB, in_f) f32
    # VPU multiply + XLU lane-reduce per output feature (out_features == 2).
    y0 = jnp.sum(x * w_ref[0:1, :], axis=-1, keepdims=True) + b_ref[0]   # (TB, 1)
    y1 = jnp.sum(x * w_ref[1:2, :], axis=-1, keepdims=True) + b_ref[1]   # (TB, 1)
    o_ref[:, 0:1] = y0.astype(o_ref.dtype)
    o_ref[:, 1:2] = y1.astype(o_ref.dtype)


def simple_model_forward(x, weight, bias, *, batch_tile=1024):
    """Forward of SimpleModel: y = x @ weight.T + bias.

    x: (B, 10) f32; weight: (2, 10) f32 (PyTorch nn.Linear layout); bias: (2,) f32.
    Weight and bias are passed exactly as PyTorch stores them - no wrapper
    transpose/reshape; the contraction layout is handled inside the kernel.
    """
    B, in_f = x.shape
    out_f = weight.shape[0]
    out_shape = jax.ShapeDtypeStruct((B, out_f), x.dtype)

    if B <= batch_tile:
        # Tiny problem: single grid-free invocation, everything resident on-chip.
        return pl.pallas_call(
            _linear_kernel,
            out_shape=out_shape,
            in_specs=[
                pl.BlockSpec(memory_space=pltpu.MemorySpace.VMEM),   # x
                pl.BlockSpec(memory_space=pltpu.MemorySpace.VMEM),   # weight (2, 10)
                pl.BlockSpec(memory_space=pltpu.MemorySpace.SMEM),   # bias (2,)
            ],
            out_specs=pl.BlockSpec(memory_space=pltpu.MemorySpace.VMEM),
        )(x, weight, bias)

    # Large batch: tile the batch dimension, replicate weight, keep bias in SMEM.
    tb = batch_tile
    grid = (pl.cdiv(B, tb),)
    return pl.pallas_call(
        _linear_kernel,
        out_shape=out_shape,
        grid=grid,
        in_specs=[
            pl.BlockSpec((tb, in_f), lambda i: (i, 0)),              # x tiles
            pl.BlockSpec((out_f, in_f), lambda i: (0, 0)),           # weight replicated
            pl.BlockSpec(memory_space=pltpu.MemorySpace.SMEM),       # bias (2,)
        ],
        out_specs=pl.BlockSpec((tb, out_f), lambda i: (i, 0)),
        compiler_params=pltpu.CompilerParams(
            dimension_semantics=("parallel",)),                      # v7x megacore split
    )(x, weight, bias)
    # TODO(synk): if this linear is ever fused downstream, store the output
    # lane-dense ((out_f, B) layout) instead of (B, 2) to avoid masked stores.


if __name__ == "__main__":
    key = jax.random.PRNGKey(0)
    k_x, k_w, k_b, k_x2 = jax.random.split(key, 4)

    B, IN, OUT = 8, 10, 2

    # Deterministic PyTorch-like uniform(-1/sqrt(IN), 1/sqrt(IN)) init.
    bound = 1.0 / (IN ** 0.5)
    weight = jax.random.uniform(k_w, (OUT, IN), jnp.float32, -bound, bound)
    bias = jax.random.uniform(k_b, (OUT,), jnp.float32, -bound, bound)

    # Small batch -> grid-free path.
    x = jax.random.normal(k_x, (B, IN), jnp.float32)
    y = simple_model_forward(x, weight, bias)
    jax.block_until_ready(y)
    y_ref = jnp.dot(x, weight.T, precision=jax.lax.Precision.HIGHEST) + bias
    assert y.shape == (B, OUT)
    assert jnp.allclose(y, y_ref, atol=1e-5, rtol=1e-5)

    # Larger batch -> batch-tiled "parallel" path.
    B2 = 4096
    x2 = jax.random.normal(k_x2, (B2, IN), jnp.float32)
    y2 = simple_model_forward(x2, weight, bias, batch_tile=1024)
    jax.block_until_ready(y2)
    y2_ref = jnp.dot(x2, weight.T, precision=jax.lax.Precision.HIGHEST) + bias
    assert y2.shape == (B2, OUT)
    assert jnp.allclose(y2, y2_ref, atol=1e-5, rtol=1e-5)

    print("KERNEL_OK")
</pallas_src>

<mosaic_0001>
module attributes {stable_mosaic.version = 11 : i64} {
  func.func @_linear_kernel(%arg0: memref<8x10xf32, #tpu.memory_space<vmem>>, %arg1: memref<2x10xf32, #tpu.memory_space<vmem>>, %arg2: memref<2xf32, #tpu.memory_space<smem>>, %arg3: memref<8x2xf32, #tpu.memory_space<vmem>>) attributes {dimension_semantics = [], scalar_prefetch = 0 : i64, scratch_operands = 0 : i64, tpu.core_type = #tpu.core_type<tc>} {
    %c0 = arith.constant 0 : index
    %c0_0 = arith.constant 0 : index
    %0 = vector.load %arg0[%c0, %c0_0] : memref<8x10xf32, #tpu.memory_space<vmem>>, vector<8x10xf32>
    %c0_1 = arith.constant 0 : index
    %c0_2 = arith.constant 0 : index
    %1 = vector.load %arg1[%c0_1, %c0_2] : memref<2x10xf32, #tpu.memory_space<vmem>>, vector<1x10xf32>
    %2 = vector.broadcast %1 : vector<1x10xf32> to vector<8x10xf32>
    %3 = arith.mulf %0, %2 : vector<8x10xf32>
    %cst = arith.constant dense<0.000000e+00> : vector<8xf32>
    %4 = vector.multi_reduction <add>, %3, %cst [1] : vector<8x10xf32> to vector<8xf32>
    %5 = vector.shape_cast %4 : vector<8xf32> to vector<8x1xf32>
    %c0_3 = arith.constant 0 : index
    %6 = memref.load %arg2[%c0_3] : memref<2xf32, #tpu.memory_space<smem>>
    %7 = vector.broadcast %6 : f32 to vector<8x1xf32>
    %8 = arith.addf %5, %7 : vector<8x1xf32>
    %c1 = arith.constant 1 : index
    %c0_4 = arith.constant 0 : index
    %9 = vector.load %arg1[%c1, %c0_4] : memref<2x10xf32, #tpu.memory_space<vmem>>, vector<1x10xf32>
    %10 = vector.broadcast %9 : vector<1x10xf32> to vector<8x10xf32>
    %11 = arith.mulf %0, %10 : vector<8x10xf32>
    %cst_5 = arith.constant dense<0.000000e+00> : vector<8xf32>
    %12 = vector.multi_reduction <add>, %11, %cst_5 [1] : vector<8x10xf32> to vector<8xf32>
    %13 = vector.shape_cast %12 : vector<8xf32> to vector<8x1xf32>
    %c1_6 = arith.constant 1 : index
    %14 = memref.load %arg2[%c1_6] : memref<2xf32, #tpu.memory_space<smem>>
    %15 = vector.broadcast %14 : f32 to vector<8x1xf32>
    %16 = arith.addf %13, %15 : vector<8x1xf32>
    %c0_7 = arith.constant 0 : index
    %c0_8 = arith.constant 0 : index
    %17 = vector.load %arg3[%c0_7, %c0_8] : memref<8x2xf32, #tpu.memory_space<vmem>>, vector<8x1xf32>
    tpu.vector_store %arg3[%c0_7, %c0_8], %8 {strides = array<i32>} : memref<8x2xf32, #tpu.memory_space<vmem>>, vector<8x1xf32>,
    %c0_9 = arith.constant 0 : index
    %c1_10 = arith.constant 1 : index
    %18 = vector.load %arg3[%c0_9, %c1_10] : memref<8x2xf32, #tpu.memory_space<vmem>>, vector<8x1xf32>
    tpu.vector_store %arg3[%c0_9, %c1_10], %16 {strides = array<i32>} : memref<8x2xf32, #tpu.memory_space<vmem>>, vector<8x1xf32>,
    return
  }
}

</mosaic_0001>

<bundles_post_ra>
// kernel: tpu_custom_call.1
= control target key start
LH: loop header
LB: loop body
LE: loop exit
PB: predicated region body
PF: predicated region fallthrough
CT: control target
= control target key end

     0   :  { %8 = vsyncpa [#allocation3], 0  ;;  %s167_s0 = inlined_call_operand.hbm [shape: f32[8,10], index: 0, kind: input, shape index: {}]   ;;  %s168_s1 = inlined_call_operand.vmem [shape: f32[2,10], index: 1, kind: input, shape index: {}]   ;;  %s169_s2 = inlined_call_operand.vmem [shape: f32[2], index: 2, kind: input, shape index: {}]   ;;  %s170_s3 = inlined_call_operand.vmem [shape: f32[8,2], index: 3, kind: output, shape index: {}]  }
   0x1   :  { %9 = vsyncpa [#allocation4], 0  ;;  %s28_s14 = sshll.u32 %s169_s2, 4  ;;  %s118_s15 = smov [#allocation2]   ;;  %s29_s14 = int_to_ptr.vmem [resolvable:$true] %s28_s14 }
   0x2   :  { %s16_s16 = sshll.u32 %s118_s15, 4  ;;  %s80_s19 = scalar_lea.hbm %s167_s0, 128  ;;  %s17_s16 = int_to_ptr.vmem [resolvable:$true] %s16_s16 }
   0x3   :  { %p81_p0 = scmp.ne.s32.totalorder %s167_s0, %s80_s19  ;;  %p84_p1 = scmp.lt.u32.totalorder %s80_s19, %s167_s0 }
   0x5   :  { %p86_p2 = pnand %p84_p1, %p81_p0 }
   0x7   :  { %89 = shalt.err (!%p86_p2)
}
   0x8   :  { %s90_s24 = scalar_lea.vmem %s17_s16, 128  ;;  %p95_p4 = scmp.lt.s32.totalorder %s17_s16, %s17_s16 }
   0x9   :  { %p91_p3 = scmp.ne.s32.totalorder %s17_s16, %s90_s24  ;;  %p96_p5 = scmp.lt.s32.totalorder %s90_s24, %s90_s24 }
   0xb   :  { %p97_p6 = por %p96_p5, %p95_p4 }
   0xd   :  { %p98_p7 = pnand %p97_p6, %p91_p3 }
   0xf   :  { %101 = shalt.err (!%p98_p7)
}
  0x10   :  { %19 = dma.hbm_to_vmem [thread:$0]  %s167_s0, 128, %s17_s16, [#allocation3]  }
  0x11   :  { %s102_s26 = scalar_lea.vmem %s29_s14, 16  ;;  %p107_p9 = scmp.lt.s32.totalorder %s29_s14, %s29_s14 }
  0x12   :  { %p103_p8 = scmp.ne.s32.totalorder %s29_s14, %s102_s26  ;;  %p108_p10 = scmp.lt.s32.totalorder %s102_s26, %s102_s26 }
  0x14   :  { %p109_p11 = por %p108_p10, %p107_p9 }
  0x16   :  { %p110_p12 = pnand %p109_p11, %p103_p8 }
  0x18   :  { %113 = shalt.err (!%p110_p12)
}
  0x19   :  { %s119_s27 = smov [#allocation5]  }
  0x1a   :  { %31 = dma.vmem_to_smem %s29_s14, 16, %s119_s27, [#allocation4]  }
  0x1b   :  { %114 = dma.done.wait [#allocation3], 128  }
  0x1c   :  { %115 = vsyncadd [#allocation3], 4294967168 }
  0x1d   :  { %116 = dma.done.wait [#allocation4], 16  }
  0x1e   :  { %117 = vsyncadd [#allocation4], 4294967280 }
  0x1f   :  { %38 = sfence }
  0x20   :  { %v39_v0 = vld [vmem:[#allocation2] sm:$0xff]  ;;  %v75_v1 = vld [vmem:[%s168_s1] ss:$0 sm:$0xff]  ;;  %vm46_vm0 = vcmask 80896   ;;  %v76_v2 = vld [vmem:[%s168_s1 + $0x1] ss:$0 sm:$0xff] }
  0x21   :  { %v45_v3 = vmul.f32 %v75_v1, %v39_v0  ;;  %v58_v4 = vmul.f32 %v76_v2, %v39_v0  ;;  %s50_s4 = sld [smem:[#allocation5]]  ;;  %s77_s5 = sld [smem:[#allocation5 + $0x1]]  ;;  %vm65_vm1 = vcmask 7168   ;;  %vm67_vm2 = vcmask 15368  }
  0x23   :  { %v47_v5 = vsel %vm46_vm0, %v45_v3, 0.0  ;;  %v59_v6 = vsel %vm46_vm0, %v58_v4, 0.0 }
  0x24   :  { %48 = vadd.xlane.f32.xlu0 %v47_v5 }
  0x27   :  { %v51_v7 = vstv %s50_s4  ;;  %v63_v10 = vstv %s77_s5 }
  0x28   :  { %60 = vadd.xlane.f32.xlu0 %v59_v6 }
  0xb1   :  { %v49_v8 = vpop.xlane.xlu0 %48 }
  0xb2   :  { %v52_v9 = vadd.f32 %v51_v7, %v49_v8 }
  0xb4   :  { %66 = vst.msk [vmem:[%s170_s3] sm:$0xff] %vm65_vm1, %v52_v9 }
  0xb5   :  { %v61_v11 = vpop.xlane.xlu0 %60 }
  0xb6   :  { %v64_v12 = vadd.f32 %v63_v10, %v61_v11 }
  0xb8   :  { %68 = vst.msk [vmem:[%s170_s3] sm:$0xff] %vm67_vm2, %v64_v12 }
  0xb9   :  { %73 = vsyncpa [#allocation3], 1 }
  0xba   :  { %74 = vsyncpa [#allocation4], 1 }

</bundles_post_ra>
